<compile_context>
chip_gen: v7x
topology: tpu7x:2x2x1
jax: 0.10.0
libtpu: 0.0.40
codegen_flags: <defaults>
</compile_context>

<pallas_src>
import jax
import jax.numpy as jnp
from jax import lax
from jax.experimental import pallas as pl
from jax.experimental.pallas import tpu as pltpu


def lstm_classifier_kernel(gx_ref,    # [Tc, Bb, 4H] bf16: precomputed x@W_ih + b (time-major)
                           whh_ref,   # [H, 4H]  bf16: concatenated recurrent weights (i,f,g,o)
                           wout_ref,  # [H, D2]  bf16: output projection
                           bout_ref,  # [1, D2]  f32
                           out_ref,   # [Bb, D2] f32 logits
                           h_sc,      # VMEM [Bb, H] f32 (persists across time chunks)
                           c_sc):     # VMEM [Bb, H] f32
    t_blk = pl.program_id(1)
    n_t = pl.num_programs(1)
    tc = gx_ref.shape[0]
    H = whh_ref.shape[0]

    @pl.when(t_blk == 0)
    def _init():
        h_sc[...] = jnp.zeros_like(h_sc)
        c_sc[...] = jnp.zeros_like(c_sc)

    # Constant weights hoisted out of the serial loop (kept off the per-step vld path).
    whh = whh_ref[...]                                   # [H, 4H] bf16

    def step(t, carry):
        h, c = carry
        # Single fused MXU op per step: [Bb,H] x [H,4H] -> [Bb,4H] f32.
        gates = (gx_ref[t].astype(jnp.float32)
                 + jnp.dot(h.astype(jnp.bfloat16), whh,
                           preferred_element_type=jnp.float32))
        sig = jax.nn.sigmoid(gates)                      # one EUP pass over the whole tile
        tnh = jnp.tanh(gates)                            # one EUP pass over the whole tile
        i_g = sig[:, 0 * H:1 * H]
        f_g = sig[:, 1 * H:2 * H]
        g_g = tnh[:, 2 * H:3 * H]
        o_g = sig[:, 3 * H:4 * H]
        c_new = f_g * c + i_g * g_g
        h_new = o_g * jnp.tanh(c_new)
        return h_new, c_new

    # h/c stay in vregs across the whole chunk; scratch is read/written once per chunk.
    unroll = True if tc <= 16 else 8
    h, c = lax.fori_loop(0, tc, step, (h_sc[...], c_sc[...]), unroll=unroll)
    h_sc[...] = h
    c_sc[...] = c

    @pl.when(t_blk == n_t - 1)
    def _finalize():
        # TODO(synk): nn.Dropout is identity in eval mode; train-mode masking not implemented.
        logits = (jnp.dot(h.astype(jnp.bfloat16), wout_ref[...],
                          preferred_element_type=jnp.float32) + bout_ref[...])
        out_ref[...] = logits.astype(out_ref.dtype)


def _tpu_kind():
    try:
        return jax.devices()[0].device_kind.lower()
    except Exception:
        return ""


def _choose_time_chunk(T, bb, h4, gx_budget_bytes):
    """Largest divisor of T whose double-buffered bf16 gx block fits the budget."""
    per_step_bytes = bb * h4 * 2                          # bf16
    max_tc = max(1, gx_budget_bytes // (2 * per_step_bytes))
    tc = 1
    for cand in range(1, T + 1):
        if T % cand == 0 and cand <= max_tc:
            tc = cand
    return tc


@jax.jit
def lstm_classifier_forward(input_ids, emb_table, w_ih, w_hh, b, w_out, b_out):
    """input_ids: [B, T] int32 -> logits [B, D2]. Weights stored [in, out]; gates (i,f,g,o)."""
    B, T = input_ids.shape
    D0 = emb_table.shape[1]
    H = w_hh.shape[0]
    H4 = 4 * H
    D2 = w_out.shape[1]

    kind = _tpu_kind()
    is_v7 = ("v7" in kind) or ("7x" in kind)
    if is_v7:
        vmem_limit = 48 * 1024 * 1024     # v7x: 64 MiB physical VMEM per TC
        gx_budget = 28 * 1024 * 1024
    else:
        vmem_limit = 64 * 1024 * 1024     # v5e/v6e: 128 MiB physical VMEM
        gx_budget = 44 * 1024 * 1024

    # Split the batch across cores only on v7x (2 TCs); on single-TC chips it just
    # serializes the whole recurrence twice.
    bb = B // 2 if (is_v7 and B % 16 == 0) else B

    # Embedding lookup in time-major order (cheap int32 reorder) so the hoisted input
    # projection directly produces the [T, B, 4H] layout the kernel streams — no big
    # HBM transpose of gates_x.
    x = jnp.take(emb_table, input_ids.T, axis=0)                          # [T, B, D0] f32

    # Hoisted input projection: one big bf16 matmul with f32 accumulation, bias folded
    # in, then rounded once to bf16 for streaming (halves HBM + VMEM traffic).
    gx = (jnp.dot(x.reshape(T * B, D0).astype(jnp.bfloat16),
                  w_ih.astype(jnp.bfloat16),
                  preferred_element_type=jnp.float32) + b[0])             # [T*B, 4H] f32
    gx = gx.astype(jnp.bfloat16).reshape(T, B, H4)                        # [T, B, 4H] bf16

    whh = w_hh.astype(jnp.bfloat16)                                       # [H, 4H]
    wout = w_out.astype(jnp.bfloat16)                                     # [H, D2]

    # VMEM-budgeted time chunk (double-buffered bf16 gx block must fit the budget).
    tc = _choose_time_chunk(T, bb, H4, gx_budget)
    grid = (B // bb, T // tc)

    return pl.pallas_call(
        lstm_classifier_kernel,
        out_shape=jax.ShapeDtypeStruct((B, D2), jnp.float32),
        grid_spec=pltpu.PrefetchScalarGridSpec(
            num_scalar_prefetch=0,
            grid=grid,
            in_specs=[
                pl.BlockSpec((tc, bb, H4), lambda bi, ti: (ti, bi, 0)),
                pl.BlockSpec((H, H4), lambda bi, ti: (0, 0)),
                pl.BlockSpec((H, D2), lambda bi, ti: (0, 0)),
                pl.BlockSpec((1, D2), lambda bi, ti: (0, 0)),
            ],
            out_specs=pl.BlockSpec((bb, D2), lambda bi, ti: (bi, 0)),
            scratch_shapes=[
                pltpu.VMEM((bb, H), jnp.float32),
                pltpu.VMEM((bb, H), jnp.float32),
            ],
        ),
        compiler_params=pltpu.CompilerParams(
            dimension_semantics=("parallel", "arbitrary"),
            vmem_limit_bytes=vmem_limit,
        ),
    )(gx, whh, wout, b_out)


def reference_forward(input_ids, emb_table, w_ih, w_hh, b, w_out, b_out,
                      mm_dtype=jnp.float32, gx_store_dtype=None):
    """Pure-JAX reference matching torch semantics (eval-mode dropout).
    mm_dtype selects matmul operand precision (f32 accumulation either way).
    gx_store_dtype, if set, mirrors the kernel's rounding of the precomputed
    input projection to that dtype before the recurrence."""
    H = w_hh.shape[0]
    x = jnp.take(emb_table, input_ids, axis=0)                            # [B, T, D0]
    B = x.shape[0]
    h = jnp.zeros((B, H), jnp.float32)
    c = jnp.zeros((B, H), jnp.float32)
    wih = w_ih.astype(mm_dtype)
    whh = w_hh.astype(mm_dtype)
    wout = w_out.astype(mm_dtype)

    def step(carry, x_t):
        h, c = carry
        gx = (jnp.dot(x_t.astype(mm_dtype), wih, preferred_element_type=jnp.float32)
              + b[0])
        if gx_store_dtype is not None:
            gx = gx.astype(gx_store_dtype).astype(jnp.float32)
        gates = gx + jnp.dot(h.astype(mm_dtype), whh, preferred_element_type=jnp.float32)
        i = jax.nn.sigmoid(gates[:, 0 * H:1 * H])
        f = jax.nn.sigmoid(gates[:, 1 * H:2 * H])
        g = jnp.tanh(gates[:, 2 * H:3 * H])
        o = jax.nn.sigmoid(gates[:, 3 * H:4 * H])
        c = f * c + i * g
        h = o * jnp.tanh(c)
        return (h, c), None

    (h, c), _ = lax.scan(step, (h, c), jnp.transpose(x, (1, 0, 2)))
    return jnp.dot(h.astype(mm_dtype), wout, preferred_element_type=jnp.float32) + b_out[0]


if __name__ == "__main__":
    # Small synthetic config: vocab_size=50, dim_list=[16, 32, 8], dropout=0.1 (eval).
    vocab_size = 50
    D0, H, D2 = 16, 32, 8
    B, T = 2, 8

    key = jax.random.PRNGKey(0)
    k_ids, k_emb, k_ih, k_hh, k_bih, k_bhh, k_wo, k_bo = jax.random.split(key, 8)

    input_ids = jax.random.randint(k_ids, (B, T), 0, vocab_size, dtype=jnp.int32)

    emb_table = 0.1 * jax.random.normal(k_emb, (vocab_size, D0), jnp.float32)
    # LSTM params, stored [in, 4H]; gate order (i, f, g, o) as in PyTorch.
    w_ih = 0.1 * jax.random.normal(k_ih, (D0, 4 * H), jnp.float32)
    w_hh = 0.1 * jax.random.normal(k_hh, (H, 4 * H), jnp.float32)
    b = (0.1 * jax.random.normal(k_bih, (1, 4 * H), jnp.float32)
         + 0.1 * jax.random.normal(k_bhh, (1, 4 * H), jnp.float32))
    # Final linear H -> D2.
    w_out = 0.1 * jax.random.normal(k_wo, (H, D2), jnp.float32)
    b_out = 0.1 * jax.random.normal(k_bo, (1, D2), jnp.float32)

    logits = lstm_classifier_forward(input_ids, emb_table, w_ih, w_hh, b, w_out, b_out)
    logits = jax.block_until_ready(logits)
    assert logits.shape == (B, D2)

    # Tight check against a reference that mirrors the kernel's precision choices
    # (bf16 matmul operands, f32 accumulation, bf16-stored gates_x).
    ref_match = reference_forward(input_ids, emb_table, w_ih, w_hh, b, w_out, b_out,
                                  mm_dtype=jnp.bfloat16, gx_store_dtype=jnp.bfloat16)
    assert jnp.allclose(logits, ref_match, atol=5e-4, rtol=5e-4), \
        "mismatch vs kernel-matched bf16 reference"

    # Loose sanity check against the exact f32 reference (bf16 rounding only).
    ref_f32 = reference_forward(input_ids, emb_table, w_ih, w_hh, b, w_out, b_out,
                                mm_dtype=jnp.float32)
    assert jnp.allclose(logits, ref_f32, atol=3e-2, rtol=3e-2), "mismatch vs f32 reference"

    print("KERNEL_OK")
</pallas_src>

<mosaic_0001>
module attributes {stable_mosaic.version = 11 : i64} {
  func.func @lstm_classifier_kernel(%arg0: i32, %arg1: i32, %arg2: memref<8x2x128xbf16, #tpu.memory_space<vmem>>, %arg3: memref<32x128xbf16, #tpu.memory_space<vmem>>, %arg4: memref<32x8xbf16, #tpu.memory_space<vmem>>, %arg5: memref<1x8xf32, #tpu.memory_space<vmem>>, %arg6: memref<2x8xf32, #tpu.memory_space<vmem>>, %arg7: memref<2x32xf32, #tpu.memory_space<vmem>>, %arg8: memref<2x32xf32, #tpu.memory_space<vmem>>) attributes {dimension_semantics = [#tpu.dimension_semantics<parallel>, #tpu.dimension_semantics<arbitrary>], iteration_bounds = array<i64: 1, 1>, scalar_prefetch = 0 : i64, scratch_operands = 2 : i64, tpu.core_type = #tpu.core_type<tc>, window_params = [{transform_indices = @transform_0, window_bounds = array<i64: 8, 2, 128>}, {pipeline_mode = #tpu.pipeline_mode<synchronous>, transform_indices = @transform_1, window_bounds = array<i64: 32, 128>}, {pipeline_mode = #tpu.pipeline_mode<synchronous>, transform_indices = @transform_2, window_bounds = array<i64: 32, 8>}, {pipeline_mode = #tpu.pipeline_mode<synchronous>, transform_indices = @transform_3, window_bounds = array<i64: 1, 8>}, {transform_indices = @transform_4, window_bounds = array<i64: 2, 8>}]} {
    %c0_i32 = arith.constant 0 : i32
    %0 = arith.cmpi eq, %arg1, %c0_i32 : i32
    %1 = arith.extui %0 : i1 to i32
    %c0_i32_0 = arith.constant 0 : i32
    %2 = arith.cmpi ne, %1, %c0_i32_0 : i32
    scf.if %2 {
      %cst_44 = arith.constant 0.000000e+00 : f32
      %187 = vector.broadcast %cst_44 : f32 to vector<2x32xf32>
      %c0_45 = arith.constant 0 : index
      %c0_46 = arith.constant 0 : index
      %188 = vector.load %arg7[%c0_45, %c0_46] : memref<2x32xf32, #tpu.memory_space<vmem>>, vector<2x32xf32>
      tpu.vector_store %arg7[%c0_45, %c0_46], %187 {strides = array<i32>} : memref<2x32xf32, #tpu.memory_space<vmem>>, vector<2x32xf32>,
      %cst_47 = arith.constant 0.000000e+00 : f32
      %189 = vector.broadcast %cst_47 : f32 to vector<2x32xf32>
      %c0_48 = arith.constant 0 : index
      %c0_49 = arith.constant 0 : index
      %190 = vector.load %arg8[%c0_48, %c0_49] : memref<2x32xf32, #tpu.memory_space<vmem>>, vector<2x32xf32>
      tpu.vector_store %arg8[%c0_48, %c0_49], %189 {strides = array<i32>} : memref<2x32xf32, #tpu.memory_space<vmem>>, vector<2x32xf32>,
    } else {
    }
    %c0 = arith.constant 0 : index
    %c0_1 = arith.constant 0 : index
    %3 = vector.load %arg3[%c0, %c0_1] : memref<32x128xbf16, #tpu.memory_space<vmem>>, vector<32x128xbf16>
    %c0_2 = arith.constant 0 : index
    %c0_3 = arith.constant 0 : index
    %4 = vector.load %arg7[%c0_2, %c0_3] : memref<2x32xf32, #tpu.memory_space<vmem>>, vector<2x32xf32>
    %c0_4 = arith.constant 0 : index
    %c0_5 = arith.constant 0 : index
    %5 = vector.load %arg8[%c0_4, %c0_5] : memref<2x32xf32, #tpu.memory_space<vmem>>, vector<2x32xf32>
    %c0_i32_6 = arith.constant 0 : i32
    %6 = arith.index_cast %c0_i32_6 : i32 to index
    %c0_7 = arith.constant 0 : index
    %c0_8 = arith.constant 0 : index
    %7 = vector.load %arg2[%6, %c0_7, %c0_8] : memref<8x2x128xbf16, #tpu.memory_space<vmem>>, vector<1x2x128xbf16>
    %8 = vector.shape_cast %7 : vector<1x2x128xbf16> to vector<2x128xbf16>
    %9 = arith.extf %8 : vector<2x128xbf16> to vector<2x128xf32>
    %10 = arith.truncf %4 : vector<2x32xf32> to vector<2x32xbf16>
    %cst = arith.constant dense<0.000000e+00> : vector<2x128xf32>
    %11 = tpu.matmul %10, %3, %cst {dimension_numbers = #tpu.dot_dimension_numbers<[1], [0], [0], [1], [0, 0, 1, 1], [], []>} : vector<2x32xbf16>, vector<32x128xbf16>, vector<2x128xf32> -> vector<2x128xf32>
    %12 = arith.addf %9, %11 : vector<2x128xf32>
    %13 = arith.negf %12 : vector<2x128xf32>
    %14 = math.exp %13 : vector<2x128xf32>
    %cst_9 = arith.constant 1.000000e+00 : f32
    %15 = vector.broadcast %cst_9 : f32 to vector<2x128xf32>
    %16 = arith.addf %15, %14 : vector<2x128xf32>
    %17 = arith.divf %15, %16 : vector<2x128xf32>
    %18 = math.tanh %12 : vector<2x128xf32>
    %19 = vector.extract_strided_slice %17 {offsets = [0, 0], sizes = [2, 32], strides = [1, 1]} : vector<2x128xf32> to vector<2x32xf32>
    %20 = vector.extract_strided_slice %17 {offsets = [0, 32], sizes = [2, 32], strides = [1, 1]} : vector<2x128xf32> to vector<2x32xf32>
    %21 = vector.extract_strided_slice %18 {offsets = [0, 64], sizes = [2, 32], strides = [1, 1]} : vector<2x128xf32> to vector<2x32xf32>
    %22 = vector.extract_strided_slice %17 {offsets = [0, 96], sizes = [2, 32], strides = [1, 1]} : vector<2x128xf32> to vector<2x32xf32>
    %23 = arith.mulf %20, %5 : vector<2x32xf32>
    %24 = arith.mulf %19, %21 : vector<2x32xf32>
    %25 = arith.addf %23, %24 : vector<2x32xf32>
    %26 = math.tanh %25 : vector<2x32xf32>
    %27 = arith.mulf %22, %26 : vector<2x32xf32>
    %c1_i32 = arith.constant 1 : i32
    %28 = arith.index_cast %c1_i32 : i32 to index
    %c0_10 = arith.constant 0 : index
    %c0_11 = arith.constant 0 : index
    %29 = vector.load %arg2[%28, %c0_10, %c0_11] : memref<8x2x128xbf16, #tpu.memory_space<vmem>>, vector<1x2x128xbf16>
    %30 = vector.shape_cast %29 : vector<1x2x128xbf16> to vector<2x128xbf16>
    %31 = arith.extf %30 : vector<2x128xbf16> to vector<2x128xf32>
    %32 = arith.truncf %27 : vector<2x32xf32> to vector<2x32xbf16>
    %cst_12 = arith.constant dense<0.000000e+00> : vector<2x128xf32>
    %33 = tpu.matmul %32, %3, %cst_12 {dimension_numbers = #tpu.dot_dimension_numbers<[1], [0], [0], [1], [0, 0, 1, 1], [], []>} : vector<2x32xbf16>, vector<32x128xbf16>, vector<2x128xf32> -> vector<2x128xf32>
    %34 = arith.addf %31, %33 : vector<2x128xf32>
    %35 = arith.negf %34 : vector<2x128xf32>
    %36 = math.exp %35 : vector<2x128xf32>
    %cst_13 = arith.constant 1.000000e+00 : f32
    %37 = vector.broadcast %cst_13 : f32 to vector<2x128xf32>
    %38 = arith.addf %37, %36 : vector<2x128xf32>
    %39 = arith.divf %37, %38 : vector<2x128xf32>
    %40 = math.tanh %34 : vector<2x128xf32>
    %41 = vector.extract_strided_slice %39 {offsets = [0, 0], sizes = [2, 32], strides = [1, 1]} : vector<2x128xf32> to vector<2x32xf32>
    %42 = vector.extract_strided_slice %39 {offsets = [0, 32], sizes = [2, 32], strides = [1, 1]} : vector<2x128xf32> to vector<2x32xf32>
    %43 = vector.extract_strided_slice %40 {offsets = [0, 64], sizes = [2, 32], strides = [1, 1]} : vector<2x128xf32> to vector<2x32xf32>
    %44 = vector.extract_strided_slice %39 {offsets = [0, 96], sizes = [2, 32], strides = [1, 1]} : vector<2x128xf32> to vector<2x32xf32>
    %45 = arith.mulf %42, %25 : vector<2x32xf32>
    %46 = arith.mulf %41, %43 : vector<2x32xf32>
    %47 = arith.addf %45, %46 : vector<2x32xf32>
    %48 = math.tanh %47 : vector<2x32xf32>
    %49 = arith.mulf %44, %48 : vector<2x32xf32>
    %c2_i32 = arith.constant 2 : i32
    %50 = arith.index_cast %c2_i32 : i32 to index
    %c0_14 = arith.constant 0 : index
    %c0_15 = arith.constant 0 : index
    %51 = vector.load %arg2[%50, %c0_14, %c0_15] : memref<8x2x128xbf16, #tpu.memory_space<vmem>>, vector<1x2x128xbf16>
    %52 = vector.shape_cast %51 : vector<1x2x128xbf16> to vector<2x128xbf16>
    %53 = arith.extf %52 : vector<2x128xbf16> to vector<2x128xf32>
    %54 = arith.truncf %49 : vector<2x32xf32> to vector<2x32xbf16>
    %cst_16 = arith.constant dense<0.000000e+00> : vector<2x128xf32>
    %55 = tpu.matmul %54, %3, %cst_16 {dimension_numbers = #tpu.dot_dimension_numbers<[1], [0], [0], [1], [0, 0, 1, 1], [], []>} : vector<2x32xbf16>, vector<32x128xbf16>, vector<2x128xf32> -> vector<2x128xf32>
    %56 = arith.addf %53, %55 : vector<2x128xf32>
    %57 = arith.negf %56 : vector<2x128xf32>
    %58 = math.exp %57 : vector<2x128xf32>
    %cst_17 = arith.constant 1.000000e+00 : f32
    %59 = vector.broadcast %cst_17 : f32 to vector<2x128xf32>
    %60 = arith.addf %59, %58 : vector<2x128xf32>
    %61 = arith.divf %59, %60 : vector<2x128xf32>
    %62 = math.tanh %56 : vector<2x128xf32>
    %63 = vector.extract_strided_slice %61 {offsets = [0, 0], sizes = [2, 32], strides = [1, 1]} : vector<2x128xf32> to vector<2x32xf32>
    %64 = vector.extract_strided_slice %61 {offsets = [0, 32], sizes = [2, 32], strides = [1, 1]} : vector<2x128xf32> to vector<2x32xf32>
    %65 = vector.extract_strided_slice %62 {offsets = [0, 64], sizes = [2, 32], strides = [1, 1]} : vector<2x128xf32> to vector<2x32xf32>
    %66 = vector.extract_strided_slice %61 {offsets = [0, 96], sizes = [2, 32], strides = [1, 1]} : vector<2x128xf32> to vector<2x32xf32>
    %67 = arith.mulf %64, %47 : vector<2x32xf32>
    %68 = arith.mulf %63, %65 : vector<2x32xf32>
    %69 = arith.addf %67, %68 : vector<2x32xf32>
    %70 = math.tanh %69 : vector<2x32xf32>
    %71 = arith.mulf %66, %70 : vector<2x32xf32>
    %c3_i32 = arith.constant 3 : i32
    %72 = arith.index_cast %c3_i32 : i32 to index
    %c0_18 = arith.constant 0 : index
    %c0_19 = arith.constant 0 : index
    %73 = vector.load %arg2[%72, %c0_18, %c0_19] : memref<8x2x128xbf16, #tpu.memory_space<vmem>>, vector<1x2x128xbf16>
    %74 = vector.shape_cast %73 : vector<1x2x128xbf16> to vector<2x128xbf16>
    %75 = arith.extf %74 : vector<2x128xbf16> to vector<2x128xf32>
    %76 = arith.truncf %71 : vector<2x32xf32> to vector<2x32xbf16>
    %cst_20 = arith.constant dense<0.000000e+00> : vector<2x128xf32>
    %77 = tpu.matmul %76, %3, %cst_20 {dimension_numbers = #tpu.dot_dimension_numbers<[1], [0], [0], [1], [0, 0, 1, 1], [], []>} : vector<2x32xbf16>, vector<32x128xbf16>, vector<2x128xf32> -> vector<2x128xf32>
    %78 = arith.addf %75, %77 : vector<2x128xf32>
    %79 = arith.negf %78 : vector<2x128xf32>
    %80 = math.exp %79 : vector<2x128xf32>
    %cst_21 = arith.constant 1.000000e+00 : f32
    %81 = vector.broadcast %cst_21 : f32 to vector<2x128xf32>
    %82 = arith.addf %81, %80 : vector<2x128xf32>
    %83 = arith.divf %81, %82 : vector<2x128xf32>
    %84 = math.tanh %78 : vector<2x128xf32>
    %85 = vector.extract_strided_slice %83 {offsets = [0, 0], sizes = [2, 32], strides = [1, 1]} : vector<2x128xf32> to vector<2x32xf32>
    %86 = vector.extract_strided_slice %83 {offsets = [0, 32], sizes = [2, 32], strides = [1, 1]} : vector<2x128xf32> to vector<2x32xf32>
    %87 = vector.extract_strided_slice %84 {offsets = [0, 64], sizes = [2, 32], strides = [1, 1]} : vector<2x128xf32> to vector<2x32xf32>
    %88 = vector.extract_strided_slice %83 {offsets = [0, 96], sizes = [2, 32], strides = [1, 1]} : vector<2x128xf32> to vector<2x32xf32>
    %89 = arith.mulf %86, %69 : vector<2x32xf32>
    %90 = arith.mulf %85, %87 : vector<2x32xf32>
    %91 = arith.addf %89, %90 : vector<2x32xf32>
    %92 = math.tanh %91 : vector<2x32xf32>
    %93 = arith.mulf %88, %92 : vector<2x32xf32>
    %c4_i32 = arith.constant 4 : i32
    %94 = arith.index_cast %c4_i32 : i32 to index
    %c0_22 = arith.constant 0 : index
    %c0_23 = arith.constant 0 : index
    %95 = vector.load %arg2[%94, %c0_22, %c0_23] : memref<8x2x128xbf16, #tpu.memory_space<vmem>>, vector<1x2x128xbf16>
    %96 = vector.shape_cast %95 : vector<1x2x128xbf16> to vector<2x128xbf16>
    %97 = arith.extf %96 : vector<2x128xbf16> to vector<2x128xf32>
    %98 = arith.truncf %93 : vector<2x32xf32> to vector<2x32xbf16>
    %cst_24 = arith.constant dense<0.000000e+00> : vector<2x128xf32>
    %99 = tpu.matmul %98, %3, %cst_24 {dimension_numbers = #tpu.dot_dimension_numbers<[1], [0], [0], [1], [0, 0, 1, 1], [], []>} : vector<2x32xbf16>, vector<32x128xbf16>, vector<2x128xf32> -> vector<2x128xf32>
    %100 = arith.addf %97, %99 : vector<2x128xf32>
    %101 = arith.negf %100 : vector<2x128xf32>
    %102 = math.exp %101 : vector<2x128xf32>
    %cst_25 = arith.constant 1.000000e+00 : f32
    %103 = vector.broadcast %cst_25 : f32 to vector<2x128xf32>
    %104 = arith.addf %103, %102 : vector<2x128xf32>
    %105 = arith.divf %103, %104 : vector<2x128xf32>
    %106 = math.tanh %100 : vector<2x128xf32>
    %107 = vector.extract_strided_slice %105 {offsets = [0, 0], sizes = [2, 32], strides = [1, 1]} : vector<2x128xf32> to vector<2x32xf32>
    %108 = vector.extract_strided_slice %105 {offsets = [0, 32], sizes = [2, 32], strides = [1, 1]} : vector<2x128xf32> to vector<2x32xf32>
    %109 = vector.extract_strided_slice %106 {offsets = [0, 64], sizes = [2, 32], strides = [1, 1]} : vector<2x128xf32> to vector<2x32xf32>
    %110 = vector.extract_strided_slice %105 {offsets = [0, 96], sizes = [2, 32], strides = [1, 1]} : vector<2x128xf32> to vector<2x32xf32>
    %111 = arith.mulf %108, %91 : vector<2x32xf32>
    %112 = arith.mulf %107, %109 : vector<2x32xf32>
    %113 = arith.addf %111, %112 : vector<2x32xf32>
    %114 = math.tanh %113 : vector<2x32xf32>
    %115 = arith.mulf %110, %114 : vector<2x32xf32>
    %c5_i32 = arith.constant 5 : i32
    %116 = arith.index_cast %c5_i32 : i32 to index
    %c0_26 = arith.constant 0 : index
    %c0_27 = arith.constant 0 : index
    %117 = vector.load %arg2[%116, %c0_26, %c0_27] : memref<8x2x128xbf16, #tpu.memory_space<vmem>>, vector<1x2x128xbf16>
    %118 = vector.shape_cast %117 : vector<1x2x128xbf16> to vector<2x128xbf16>
    %119 = arith.extf %118 : vector<2x128xbf16> to vector<2x128xf32>
    %120 = arith.truncf %115 : vector<2x32xf32> to vector<2x32xbf16>
    %cst_28 = arith.constant dense<0.000000e+00> : vector<2x128xf32>
    %121 = tpu.matmul %120, %3, %cst_28 {dimension_numbers = #tpu.dot_dimension_numbers<[1], [0], [0], [1], [0, 0, 1, 1], [], []>} : vector<2x32xbf16>, vector<32x128xbf16>, vector<2x128xf32> -> vector<2x128xf32>
    %122 = arith.addf %119, %121 : vector<2x128xf32>
    %123 = arith.negf %122 : vector<2x128xf32>
    %124 = math.exp %123 : vector<2x128xf32>
    %cst_29 = arith.constant 1.000000e+00 : f32
    %125 = vector.broadcast %cst_29 : f32 to vector<2x128xf32>
    %126 = arith.addf %125, %124 : vector<2x128xf32>
    %127 = arith.divf %125, %126 : vector<2x128xf32>
    %128 = math.tanh %122 : vector<2x128xf32>
    %129 = vector.extract_strided_slice %127 {offsets = [0, 0], sizes = [2, 32], strides = [1, 1]} : vector<2x128xf32> to vector<2x32xf32>
    %130 = vector.extract_strided_slice %127 {offsets = [0, 32], sizes = [2, 32], strides = [1, 1]} : vector<2x128xf32> to vector<2x32xf32>
    %131 = vector.extract_strided_slice %128 {offsets = [0, 64], sizes = [2, 32], strides = [1, 1]} : vector<2x128xf32> to vector<2x32xf32>
    %132 = vector.extract_strided_slice %127 {offsets = [0, 96], sizes = [2, 32], strides = [1, 1]} : vector<2x128xf32> to vector<2x32xf32>
    %133 = arith.mulf %130, %113 : vector<2x32xf32>
    %134 = arith.mulf %129, %131 : vector<2x32xf32>
    %135 = arith.addf %133, %134 : vector<2x32xf32>
    %136 = math.tanh %135 : vector<2x32xf32>
    %137 = arith.mulf %132, %136 : vector<2x32xf32>
    %c6_i32 = arith.constant 6 : i32
    %138 = arith.index_cast %c6_i32 : i32 to index
    %c0_30 = arith.constant 0 : index
    %c0_31 = arith.constant 0 : index
    %139 = vector.load %arg2[%138, %c0_30, %c0_31] : memref<8x2x128xbf16, #tpu.memory_space<vmem>>, vector<1x2x128xbf16>
    %140 = vector.shape_cast %139 : vector<1x2x128xbf16> to vector<2x128xbf16>
    %141 = arith.extf %140 : vector<2x128xbf16> to vector<2x128xf32>
    %142 = arith.truncf %137 : vector<2x32xf32> to vector<2x32xbf16>
    %cst_32 = arith.constant dense<0.000000e+00> : vector<2x128xf32>
    %143 = tpu.matmul %142, %3, %cst_32 {dimension_numbers = #tpu.dot_dimension_numbers<[1], [0], [0], [1], [0, 0, 1, 1], [], []>} : vector<2x32xbf16>, vector<32x128xbf16>, vector<2x128xf32> -> vector<2x128xf32>
    %144 = arith.addf %141, %143 : vector<2x128xf32>
    %145 = arith.negf %144 : vector<2x128xf32>
    %146 = math.exp %145 : vector<2x128xf32>
    %cst_33 = arith.constant 1.000000e+00 : f32
    %147 = vector.broadcast %cst_33 : f32 to vector<2x128xf32>
    %148 = arith.addf %147, %146 : vector<2x128xf32>
    %149 = arith.divf %147, %148 : vector<2x128xf32>
    %150 = math.tanh %144 : vector<2x128xf32>
    %151 = vector.extract_strided_slice %149 {offsets = [0, 0], sizes = [2, 32], strides = [1, 1]} : vector<2x128xf32> to vector<2x32xf32>
    %152 = vector.extract_strided_slice %149 {offsets = [0, 32], sizes = [2, 32], strides = [1, 1]} : vector<2x128xf32> to vector<2x32xf32>
    %153 = vector.extract_strided_slice %150 {offsets = [0, 64], sizes = [2, 32], strides = [1, 1]} : vector<2x128xf32> to vector<2x32xf32>
    %154 = vector.extract_strided_slice %149 {offsets = [0, 96], sizes = [2, 32], strides = [1, 1]} : vector<2x128xf32> to vector<2x32xf32>
    %155 = arith.mulf %152, %135 : vector<2x32xf32>
    %156 = arith.mulf %151, %153 : vector<2x32xf32>
    %157 = arith.addf %155, %156 : vector<2x32xf32>
    %158 = math.tanh %157 : vector<2x32xf32>
    %159 = arith.mulf %154, %158 : vector<2x32xf32>
    %c7_i32 = arith.constant 7 : i32
    %160 = arith.index_cast %c7_i32 : i32 to index
    %c0_34 = arith.constant 0 : index
    %c0_35 = arith.constant 0 : index
    %161 = vector.load %arg2[%160, %c0_34, %c0_35] : memref<8x2x128xbf16, #tpu.memory_space<vmem>>, vector<1x2x128xbf16>
    %162 = vector.shape_cast %161 : vector<1x2x128xbf16> to vector<2x128xbf16>
    %163 = arith.extf %162 : vector<2x128xbf16> to vector<2x128xf32>
    %164 = arith.truncf %159 : vector<2x32xf32> to vector<2x32xbf16>
    %cst_36 = arith.constant dense<0.000000e+00> : vector<2x128xf32>
    %165 = tpu.matmul %164, %3, %cst_36 {dimension_numbers = #tpu.dot_dimension_numbers<[1], [0], [0], [1], [0, 0, 1, 1], [], []>} : vector<2x32xbf16>, vector<32x128xbf16>, vector<2x128xf32> -> vector<2x128xf32>
    %166 = arith.addf %163, %165 : vector<2x128xf32>
    %167 = arith.negf %166 : vector<2x128xf32>
    %168 = math.exp %167 : vector<2x128xf32>
    %cst_37 = arith.constant 1.000000e+00 : f32
    %169 = vector.broadcast %cst_37 : f32 to vector<2x128xf32>
    %170 = arith.addf %169, %168 : vector<2x128xf32>
    %171 = arith.divf %169, %170 : vector<2x128xf32>
    %172 = math.tanh %166 : vector<2x128xf32>
    %173 = vector.extract_strided_slice %171 {offsets = [0, 0], sizes = [2, 32], strides = [1, 1]} : vector<2x128xf32> to vector<2x32xf32>
    %174 = vector.extract_strided_slice %171 {offsets = [0, 32], sizes = [2, 32], strides = [1, 1]} : vector<2x128xf32> to vector<2x32xf32>
    %175 = vector.extract_strided_slice %172 {offsets = [0, 64], sizes = [2, 32], strides = [1, 1]} : vector<2x128xf32> to vector<2x32xf32>
    %176 = vector.extract_strided_slice %171 {offsets = [0, 96], sizes = [2, 32], strides = [1, 1]} : vector<2x128xf32> to vector<2x32xf32>
    %177 = arith.mulf %174, %157 : vector<2x32xf32>
    %178 = arith.mulf %173, %175 : vector<2x32xf32>
    %179 = arith.addf %177, %178 : vector<2x32xf32>
    %180 = math.tanh %179 : vector<2x32xf32>
    %181 = arith.mulf %176, %180 : vector<2x32xf32>
    %c8_i32 = arith.constant 8 : i32
    %c0_38 = arith.constant 0 : index
    %c0_39 = arith.constant 0 : index
    %182 = vector.load %arg7[%c0_38, %c0_39] : memref<2x32xf32, #tpu.memory_space<vmem>>, vector<2x32xf32>
    tpu.vector_store %arg7[%c0_38, %c0_39], %181 {strides = array<i32>} : memref<2x32xf32, #tpu.memory_space<vmem>>, vector<2x32xf32>,
    %c0_40 = arith.constant 0 : index
    %c0_41 = arith.constant 0 : index
    %183 = vector.load %arg8[%c0_40, %c0_41] : memref<2x32xf32, #tpu.memory_space<vmem>>, vector<2x32xf32>
    tpu.vector_store %arg8[%c0_40, %c0_41], %179 {strides = array<i32>} : memref<2x32xf32, #tpu.memory_space<vmem>>, vector<2x32xf32>,
    %c0_i32_42 = arith.constant 0 : i32
    %184 = arith.cmpi eq, %arg1, %c0_i32_42 : i32
    %185 = arith.extui %184 : i1 to i32
    %c0_i32_43 = arith.constant 0 : i32
    %186 = arith.cmpi ne, %185, %c0_i32_43 : i32
    scf.if %186 {
      %187 = arith.truncf %181 : vector<2x32xf32> to vector<2x32xbf16>
      %c0_44 = arith.constant 0 : index
      %c0_45 = arith.constant 0 : index
      %188 = vector.load %arg4[%c0_44, %c0_45] : memref<32x8xbf16, #tpu.memory_space<vmem>>, vector<32x8xbf16>
      %cst_46 = arith.constant dense<0.000000e+00> : vector<2x8xf32>
      %189 = tpu.matmul %187, %188, %cst_46 {dimension_numbers = #tpu.dot_dimension_numbers<[1], [0], [0], [1], [0, 0, 1, 1], [], []>} : vector<2x32xbf16>, vector<32x8xbf16>, vector<2x8xf32> -> vector<2x8xf32>
      %c0_47 = arith.constant 0 : index
      %c0_48 = arith.constant 0 : index
      %190 = vector.load %arg5[%c0_47, %c0_48] : memref<1x8xf32, #tpu.memory_space<vmem>>, vector<1x8xf32>
      %191 = vector.broadcast %190 : vector<1x8xf32> to vector<2x8xf32>
      %192 = arith.addf %189, %191 : vector<2x8xf32>
      %c0_49 = arith.constant 0 : index
      %c0_50 = arith.constant 0 : index
      %193 = vector.load %arg6[%c0_49, %c0_50] : memref<2x8xf32, #tpu.memory_space<vmem>>, vector<2x8xf32>
      tpu.vector_store %arg6[%c0_49, %c0_50], %192 {strides = array<i32>} : memref<2x8xf32, #tpu.memory_space<vmem>>, vector<2x8xf32>,
    } else {
    }
    return
  }
  func.func @transform_0(%arg0: i32, %arg1: i32) -> (i32, i32, i32) {
    %c0_i32 = arith.constant 0 : i32
    %c0_i32_0 = arith.constant 0 : i32
    return %arg1, %arg0, %c0_i32 : i32, i32, i32
  }
  func.func @transform_1(%arg0: i32, %arg1: i32) -> (i32, i32) {
    %c0_i32 = arith.constant 0 : i32
    %c0_i32_0 = arith.constant 0 : i32
    %c0_i32_1 = arith.constant 0 : i32
    return %c0_i32, %c0_i32_0 : i32, i32
  }
  func.func @transform_2(%arg0: i32, %arg1: i32) -> (i32, i32) {
    %c0_i32 = arith.constant 0 : i32
    %c0_i32_0 = arith.constant 0 : i32
    %c0_i32_1 = arith.constant 0 : i32
    return %c0_i32, %c0_i32_0 : i32, i32
  }
  func.func @transform_3(%arg0: i32, %arg1: i32) -> (i32, i32) {
    %c0_i32 = arith.constant 0 : i32
    %c0_i32_0 = arith.constant 0 : i32
    %c0_i32_1 = arith.constant 0 : i32
    return %c0_i32, %c0_i32_0 : i32, i32
  }
  func.func @transform_4(%arg0: i32, %arg1: i32) -> (i32, i32) {
    %c0_i32 = arith.constant 0 : i32
    %c0_i32_0 = arith.constant 0 : i32
    return %arg0, %c0_i32 : i32, i32
  }
}

</mosaic_0001>

<bundles_post_ra>
// kernel: lstm_classifier_forward.1
= control target key start
LH: loop header
LB: loop body
LE: loop exit
PB: predicated region body
PF: predicated region fallthrough
CT: control target
= control target key end

     0   :  { %9 = vsyncpa [#allocation5], 0  ;;  %s1354_s0 = inlined_call_operand.hbm [shape: bf16[8,2,128], index: 0, kind: input, shape index: {}]   ;;  %s1355_s1 = inlined_call_operand.hbm [shape: bf16[32,128], index: 1, kind: input, shape index: {}]   ;;  %s1356_s2 = inlined_call_operand.hbm [shape: bf16[32,8], index: 2, kind: input, shape index: {}]   ;;  %s1357_s3 = inlined_call_operand.hbm [shape: f32[1,8], index: 3, kind: input, shape index: {}]   ;;  %s1358_s4 = inlined_call_operand.hbm [shape: f32[2,8], index: 4, kind: output, shape index: {}]  }
   0x1   :  { %10 = vsyncpa [#allocation8], 0 }
   0x2   :  { %11 = vsyncpa [#allocation11], 0 }
   0x3   :  { %12 = vsyncpa [#allocation6], 0  ;;  %s1144_s15 = smov [#allocation7]   ;;  %s1026_s19 = scalar_lea.hbm %s1355_s1, 256 }
   0x4   :  { %s30_s16 = sshll.u32 %s1144_s15, 4  ;;  %p1027_p0 = scmp.ne.s32.totalorder %s1355_s1, %s1026_s19  ;;  %s31_s16 = int_to_ptr.vmem [resolvable:$true] %s30_s16 }
   0x5   :  { %p1030_p1 = scmp.lt.u32.totalorder %s1026_s19, %s1355_s1 }
   0x7   :  { %p1032_p2 = pnand %p1030_p1, %p1027_p0 }
   0x9   :  { %1035 = shalt.err (!%p1032_p2)
}
   0xa   :  { %s1036_s24 = scalar_lea.vmem %s31_s16, 256  ;;  %p1041_p4 = scmp.lt.s32.totalorder %s31_s16, %s31_s16 }
   0xb   :  { %p1037_p3 = scmp.ne.s32.totalorder %s31_s16, %s1036_s24  ;;  %p1042_p5 = scmp.lt.s32.totalorder %s1036_s24, %s1036_s24 }
   0xd   :  { %p1043_p6 = por %p1042_p5, %p1041_p4 }
   0xf   :  { %p1044_p7 = pnand %p1043_p6, %p1037_p3 }
  0x11   :  { %1047 = shalt.err (!%p1044_p7)
}
  0x12   :  { %s1145_s25 = smov 64   ;;  %s1146_s26 = smov 4  }
  0x13   :  { %36 = dma.hbm_to_vmem [thread:$0]  %s1355_s1, 256, %s31_s16, [#allocation8], %s1145_s25, %s1145_s25, %s1146_s26  }
  0x14   :  { %s1147_s29 = smov [#allocation4]   ;;  %s1048_s7 = scalar_lea.hbm %s1354_s0, 128 }
  0x15   :  { %s18_s30 = sshll.u32 %s1147_s29, 4  ;;  %p1049_p8 = scmp.ne.s32.totalorder %s1354_s0, %s1048_s7  ;;  %s19_s30 = int_to_ptr.vmem [resolvable:$true] %s18_s30 }
  0x16   :  { %p1052_p9 = scmp.lt.u32.totalorder %s1048_s7, %s1354_s0 }
  0x18   :  { %p1054_p10 = pnand %p1052_p9, %p1049_p8 }
  0x1a   :  { %1057 = shalt.err (!%p1054_p10)
}
  0x1b   :  { %s1058_s12 = scalar_lea.vmem %s19_s30, 128  ;;  %p1063_p12 = scmp.lt.s32.totalorder %s19_s30, %s19_s30 }
  0x1c   :  { %p1059_p11 = scmp.ne.s32.totalorder %s19_s30, %s1058_s12  ;;  %p1064_p13 = scmp.lt.s32.totalorder %s1058_s12, %s1058_s12 }
  0x1e   :  { %p1065_p0 = por %p1064_p13, %p1063_p12 }
  0x20   :  { %p1066_p1 = pnand %p1065_p0, %p1059_p11 }
  0x22   :  { %1069 = shalt.err (!%p1066_p1)
}
  0x23   :  { %s1148_s1 = smov 16   ;;  %s1149_s13 = smov 1  }
  0x24   :  { %24 = dma.hbm_to_vmem [thread:$0]  %s1354_s0, 128, %s19_s30, [#allocation5], %s1148_s1, %s1148_s1, %s1149_s13  }
  0x25   :  { %s1150_s16 = smov [#allocation9]   ;;  %s1151_s18 = smov [#allocation10]  }
  0x26   :  { %s42_s17 = sshll.u32 %s1150_s16, 4  ;;  %s55_s19 = sshll.u32 %s1151_s18, 4  ;;  %s43_s17 = int_to_ptr.vmem [resolvable:$true] %s42_s17  ;;  %s56_s19 = int_to_ptr.vmem [resolvable:$true] %s55_s19 }
  0x27   :  { %s1070_s22 = scalar_lea.hbm %s1356_s2, 256 }
  0x28   :  { %p1071_p2 = scmp.ne.s32.totalorder %s1356_s2, %s1070_s22  ;;  %p1074_p3 = scmp.lt.u32.totalorder %s1070_s22, %s1356_s2 }
  0x2a   :  { %p1076_p4 = pnand %p1074_p3, %p1071_p2 }
  0x2c   :  { %1079 = shalt.err (!%p1076_p4)
}
  0x2d   :  { %s1080_s0 = scalar_lea.vmem %s43_s17, 256  ;;  %p1085_p6 = scmp.lt.s32.totalorder %s43_s17, %s43_s17 }
  0x2e   :  { %p1081_p5 = scmp.ne.s32.totalorder %s43_s17, %s1080_s0  ;;  %p1086_p7 = scmp.lt.s32.totalorder %s1080_s0, %s1080_s0 }
  0x30   :  { %p1087_p8 = por %p1086_p7, %p1085_p6 }
  0x32   :  { %p1088_p9 = pnand %p1087_p8, %p1081_p5 }
  0x34   :  { %1091 = shalt.err (!%p1088_p9)
}
  0x35   :  { %48 = dma.hbm_to_vmem [thread:$0]  %s1356_s2, 256, %s43_s17, [#allocation8], %s1145_s25, %s1145_s25, %s1146_s26  }
  0x36   :  { %s1092_s7 = scalar_lea.hbm %s1357_s3, 16 }
  0x37   :  { %p1093_p10 = scmp.ne.s32.totalorder %s1357_s3, %s1092_s7  ;;  %p1096_p11 = scmp.lt.u32.totalorder %s1092_s7, %s1357_s3 }
  0x39   :  { %p1098_p12 = pnand %p1096_p11, %p1093_p10 }
  0x3b   :  { %1101 = shalt.err (!%p1098_p12)
}
  0x3c   :  { %s1102_s12 = scalar_lea.vmem %s56_s19, 16  ;;  %s1106_s1 = scalar_lea.vmem %s56_s19, 32 }
  0x3d   :  { %p1103_p13 = scmp.ne.s32.totalorder %s56_s19, %s1102_s12  ;;  %p1107_p0 = scmp.lt.s32.totalorder %s56_s19, %s56_s19 }
  0x3e   :  { %p1108_p1 = scmp.lt.s32.totalorder %s1106_s1, %s1102_s12 }
  0x40   :  { %p1109_p2 = por %p1108_p1, %p1107_p0 }
  0x42   :  { %p1110_p3 = pnand %p1109_p2, %p1103_p13 }
  0x44   :  { %1113 = shalt.err (!%p1110_p3)
}
  0x45   :  { %58 = dma.hbm_to_vmem [thread:$0]  %s1357_s3, 16, %s56_s19, [#allocation11]  }
  0x46   :  { %1136 = dma.done.wait [#allocation5], 128  }
  0x47   :  { %1137 = vsyncadd [#allocation5], 4294967168 }
  0x48   :  { %1138 = dma.done.wait [#allocation8], 512  }
  0x49   :  { %1139 = vsyncadd [#allocation8], 4294966784 }
  0x4a   :  { %1140 = dma.done.wait [#allocation11], 16  }
  0x4b   :  { %1141 = vsyncadd [#allocation11], 4294967280  ;;  %vm76_vm0 = vcmask 254976   ;;  %v1152_v0 = vmov 0.0   ;;  %vm1153_vm1 = vmmov 0   ;;  %v1247_v1 = vld [vmem:[#allocation7] sm:$0xff]  }
  0x4c   :  { %872 = vmatprep.subr.bf16.mxu0 %v1152_v0  ;;  %876 = vmatprep.mubr.msk.bf16.mxu0 %vm1153_vm1, %v1152_v0  ;;  %77 = vst.msk [vmem:[#allocation2] sm:$0x3] %vm76_vm0, %v1152_v0  ;;  %78 = vst.msk [vmem:[#allocation3] sm:$0x3] %vm76_vm0, %v1152_v0  ;;  %v1250_v2 = vld [vmem:[#allocation7 + $0x8] sm:$0xff]   ;;  %vm100_vm2 = vcmask 261120  }
  0x4d   :  { %880 = vmatprep.subr.bf16.mxu1 %v1152_v0  ;;  %884 = vmatprep.mubr.msk.bf16.mxu1 %vm1153_vm1, %v1152_v0  ;;  %v85_v5 = vld [vmem:[#allocation4] sm:$0x1]  ;;  %s1154_s3 = smov 32   ;;  %v181_v29 = vld [vmem:[#allocation4 + $0x1] sm:$0x1]  ;;  %s1156_s13 = smov 96  }
  0x4e   :  { %873 = vmatpush3.bf16.msra.mxu0 %v1247_v1  ;;  %881 = vmatpush3.bf16.msra.mxu1 %v1247_v1  ;;  %v86_v6 = vunpack.c.l.bf16 %v85_v5  ;;  %v182_v30 = vunpack.c.l.bf16 %v181_v29  ;;  %v256_v51 = vld [vmem:[#allocation4 + $0x2] sm:$0x1]  ;;  %vm803_vm3 = vcmask 58368  }
  0x4f   :  { %874 = vmatprep.subr.bf16.mxu0 %v1152_v0  ;;  %882 = vmatprep.subr.bf16.mxu1 %v1152_v0  ;;  %v257_v52 = vunpack.c.l.bf16 %v256_v51 }
  0x52   :  { %875 = vmatpush3.bf16.msra.mxu0 %v1250_v2  ;;  %883 = vmatpush3.bf16.msra.mxu1 %v1250_v2 }
  0x53   :  { %v83_v3 = vld [vmem:[#allocation2] sm:$0x3]  ;;  %888 = vmatprep.subr.bf16.mxu0 %v1152_v0  ;;  %896 = vmatprep.subr.bf16.mxu1 %v1152_v0  ;;  %v826_v13 = vld.sshfl [vmem:[#allocation3] sm:$0x3 pattern:$0x76325410] }
  0x54   :  { %v87_v4 = vpack.c.bf16 %v83_v3, %v83_v3 }
  0x56   :  { %877 = vmatmul.mubr.msk.bf16.vlgmr.msra.gmra.mrb[0].mxu0 %vm100_vm2, %v87_v4 }
  0x57   :  { %889 = vmatpush3.bf16.msra.mxu0 %v1247_v1  ;;  %892 = vmatprep.mubr.msk.bf16.mxu0 %vm1153_vm1, %v1152_v0 }
  0x58   :  { %890 = vmatprep.subr.bf16.mxu0 %v1152_v0 }
  0x5b   :  { %891 = vmatpush3.bf16.msra.mxu0 %v1250_v2 }
  0x5c   :  { %904 = vmatprep.subr.bf16.mxu0 %v1152_v0 }
 0x129   :  { %v138_v7 = vpop.f32.mrb[0].mxu0 }
 0x12a   :  { %v144_v8 = vadd.f32 %v138_v7, %v86_v6  ;;  %v878_v9 = vpop.f32.mrb[1].mxu0 }
 0x12b   :  { %v141_v10 = vpop.f32.mrb[2].mxu0 }
 0x12c   :  { %v879_v11 = vpop.f32.mrb[3].mxu0  ;;  %962 = vtanh.f32 %v144_v8  ;;  %v825_v14 = vmul.f32 -1.442695, %v144_v8 }
 0x12e   :  { %964 = vpow2.f32 %v825_v14 }
 0x136   :  { %v963_v12 = vpop.eup %962 }
 0x137   :  { %165 = vrot.lane.b32.xlu0 %v963_v12, %s1145_s25  ;;  %v331_v12 = vld [vmem:[#allocation4 + $0x3] sm:$0x1] }
 0x138   :  { %v965_v15 = vpop.eup %964 }
 0x139   :  { %v148_v16 = vadd.f32 1.0, %v965_v15 }
 0x13b   :  { %160 = vrot.lane.b32.xlu0 %v826_v13, %s1154_s3  ;;  %966 = vrcp.f32 %v148_v16  ;;  %v332_v13 = vunpack.c.l.bf16 %v331_v12 }
 0x145   :  { %v967_v17 = vpop.eup %966 }
 0x1a9   :  { %v166_v18 = vpop.permute.xlu0 %165 }
 0x1aa   :  { %v168_v19 = vmul.f32 %v967_v17, %v166_v18 }
 0x1ac   :  { %170 = vrot.lane.b32.xlu1 %v168_v19, %s1154_s3 }
 0x1ad   :  { %v161_v20 = vpop.permute.xlu0 %160 }
 0x1ae   :  { %v163_v21 = vmul.f32 %v967_v17, %v161_v20 }
 0x21e   :  { %v171_v22 = vpop.permute.xlu1 %170 }
 0x21f   :  { %v173_v23 = vadd.f32 %v171_v22, %v163_v21 }
 0x221   :  { %968 = vtanh.f32 %v173_v23 }
 0x22b   :  { %v969_v24 = vpop.eup %968 }
 0x22c   :  { %176 = vrot.lane.b32.xlu1 %v969_v24, %s1145_s25 }
 0x29e   :  { %v177_v25 = vpop.permute.xlu1 %176 }
 0x29f   :  { %v179_v26 = vmul.f32 %v967_v17, %v177_v25 }
 0x2a1   :  { %v183_v27 = vpack.c.bf16 %v179_v26, %v179_v26 }
 0x2a3   :  { %185 = vrot.lane.b32.xlu0 %v183_v27, %s1154_s3 }
 0x315   :  { %v186_v28 = vpop.permute.xlu0 %185 }
 0x316   :  { %885 = vmatmul.mubr.msk.bf16.vlgmr.msra.gmra.mrb[0].mxu1 %vm100_vm2, %v186_v28 }
 0x317   :  { %897 = vmatpush3.bf16.msra.mxu1 %v1247_v1  ;;  %900 = vmatprep.mubr.msk.bf16.mxu1 %vm1153_vm1, %v1152_v0 }
 0x318   :  { %898 = vmatprep.subr.bf16.mxu1 %v1152_v0 }
 0x31b   :  { %899 = vmatpush3.bf16.msra.mxu1 %v1250_v2 }
 0x31c   :  { %912 = vmatprep.subr.bf16.mxu1 %v1152_v0 }
 0x3e9   :  { %v224_v31 = vpop.f32.mrb[0].mxu1 }
 0x3ea   :  { %v230_v32 = vadd.f32 %v224_v31, %v182_v30  ;;  %v886_v33 = vpop.f32.mrb[1].mxu1 }
 0x3eb   :  { %v227_v34 = vpop.f32.mrb[2].mxu1 }
 0x3ec   :  { %970 = vtanh.f32 %v230_v32  ;;  %v887_v35 = vpop.f32.mrb[3].mxu1  ;;  %v828_v37 = vmul.f32 -1.442695, %v230_v32  ;;  %v406_v34 = vld [vmem:[#allocation4 + $0x4] sm:$0x1] }
 0x3ed   :  { %v407_v35 = vunpack.c.l.bf16 %v406_v34 }
 0x3ee   :  { %972 = vpow2.f32 %v828_v37 }
 0x3f6   :  { %v971_v36 = vpop.eup %970 }
 0x3f7   :  { %240 = vrot.lane.b32.xlu1 %v971_v36, %s1145_s25 }
 0x3f8   :  { %v973_v38 = vpop.eup %972 }
 0x3f9   :  { %v234_v39 = vadd.f32 1.0, %v973_v38 }
 0x3fb   :  { %974 = vrcp.f32 %v234_v39 }
 0x405   :  { %v975_v40 = vpop.eup %974 }
 0x406   :  { %v238_v43 = vmul.f32 %v975_v40, %v173_v23 }
 0x469   :  { %v241_v41 = vpop.permute.xlu1 %240 }
 0x46a   :  { %v243_v42 = vmul.f32 %v975_v40, %v241_v41 }
 0x46c   :  { %245 = vrot.lane.b32.xlu0 %v243_v42, %s1154_s3 }
 0x4de   :  { %v246_v44 = vpop.permute.xlu0 %245 }
 0x4df   :  { %v248_v45 = vadd.f32 %v246_v44, %v238_v43 }
 0x4e1   :  { %976 = vtanh.f32 %v248_v45 }
 0x4eb   :  { %v977_v46 = vpop.eup %976 }
 0x4ec   :  { %251 = vrot.lane.b32.xlu1 %v977_v46, %s1145_s25 }
 0x55e   :  { %v252_v47 = vpop.permute.xlu1 %251 }
 0x55f   :  { %v254_v48 = vmul.f32 %v975_v40, %v252_v47 }
 0x561   :  { %v258_v49 = vpack.c.bf16 %v254_v48, %v254_v48 }
 0x563   :  { %260 = vrot.lane.b32.xlu0 %v258_v49, %s1154_s3 }
 0x5d5   :  { %v261_v50 = vpop.permute.xlu0 %260 }
 0x5d6   :  { %893 = vmatmul.mubr.msk.bf16.vlgmr.msra.gmra.mrb[4].mxu0 %vm100_vm2, %v261_v50 }
 0x5d7   :  { %905 = vmatpush3.bf16.msra.mxu0 %v1247_v1  ;;  %908 = vmatprep.mubr.msk.bf16.mxu0 %vm1153_vm1, %v1152_v0 }
 0x5d8   :  { %906 = vmatprep.subr.bf16.mxu0 %v1152_v0 }
 0x5db   :  { %907 = vmatpush3.bf16.msra.mxu0 %v1250_v2 }
 0x5dc   :  { %920 = vmatprep.subr.bf16.mxu0 %v1152_v0 }
 0x6a9   :  { %v299_v53 = vpop.f32.mrb[4].mxu0 }
 0x6aa   :  { %v305_v54 = vadd.f32 %v299_v53, %v257_v52  ;;  %v894_v55 = vpop.f32.mrb[5].mxu0 }
 0x6ab   :  { %v302_v56 = vpop.f32.mrb[6].mxu0 }
 0x6ac   :  { %978 = vtanh.f32 %v305_v54  ;;  %v895_v57 = vpop.f32.mrb[7].mxu0  ;;  %v830_v59 = vmul.f32 -1.442695, %v305_v54  ;;  %v481_v56 = vld [vmem:[#allocation4 + $0x5] sm:$0x1] }
 0x6ad   :  { %v482_v57 = vunpack.c.l.bf16 %v481_v56 }
 0x6ae   :  { %980 = vpow2.f32 %v830_v59 }
 0x6b6   :  { %v979_v58 = vpop.eup %978 }
 0x6b7   :  { %315 = vrot.lane.b32.xlu1 %v979_v58, %s1145_s25 }
 0x6b8   :  { %v981_v60 = vpop.eup %980 }
 0x6b9   :  { %v309_v61 = vadd.f32 1.0, %v981_v60 }
 0x6bb   :  { %982 = vrcp.f32 %v309_v61 }
 0x6c5   :  { %v983_v62 = vpop.eup %982 }
 0x6c6   :  { %v313_v4 = vmul.f32 %v983_v62, %v248_v45 }
 0x729   :  { %v316_v63 = vpop.permute.xlu1 %315 }
 0x72a   :  { %v318_v3 = vmul.f32 %v983_v62, %v316_v63 }
 0x72c   :  { %320 = vrot.lane.b32.xlu0 %v318_v3, %s1154_s3 }
 0x79e   :  { %v321_v5 = vpop.permute.xlu0 %320 }
 0x79f   :  { %v323_v6 = vadd.f32 %v321_v5, %v313_v4 }
 0x7a1   :  { %984 = vtanh.f32 %v323_v6 }
 0x7ab   :  { %v985_v7 = vpop.eup %984 }
 0x7ac   :  { %326 = vrot.lane.b32.xlu1 %v985_v7, %s1145_s25 }
 0x81e   :  { %v327_v8 = vpop.permute.xlu1 %326 }
 0x81f   :  { %v329_v9 = vmul.f32 %v983_v62, %v327_v8 }
 0x821   :  { %v333_v10 = vpack.c.bf16 %v329_v9, %v329_v9 }
 0x823   :  { %335 = vrot.lane.b32.xlu0 %v333_v10, %s1154_s3 }
 0x895   :  { %v336_v11 = vpop.permute.xlu0 %335 }
 0x896   :  { %901 = vmatmul.mubr.msk.bf16.vlgmr.msra.gmra.mrb[4].mxu1 %vm100_vm2, %v336_v11 }
 0x897   :  { %913 = vmatpush3.bf16.msra.mxu1 %v1247_v1  ;;  %916 = vmatprep.mubr.msk.bf16.mxu1 %vm1153_vm1, %v1152_v0 }
 0x898   :  { %914 = vmatprep.subr.bf16.mxu1 %v1152_v0 }
 0x89b   :  { %915 = vmatpush3.bf16.msra.mxu1 %v1250_v2 }
 0x89c   :  { %928 = vmatprep.subr.bf16.mxu1 %v1152_v0 }
 0x969   :  { %v374_v14 = vpop.f32.mrb[4].mxu1 }
 0x96a   :  { %v380_v15 = vadd.f32 %v374_v14, %v332_v13  ;;  %v902_v16 = vpop.f32.mrb[5].mxu1 }
 0x96b   :  { %v377_v17 = vpop.f32.mrb[6].mxu1 }
 0x96c   :  { %986 = vtanh.f32 %v380_v15  ;;  %v903_v18 = vpop.f32.mrb[7].mxu1  ;;  %v832_v20 = vmul.f32 -1.442695, %v380_v15  ;;  %v556_v15 = vld [vmem:[#allocation4 + $0x6] sm:$0x1] }
 0x96d   :  { %v557_v16 = vunpack.c.l.bf16 %v556_v15 }
 0x96e   :  { %988 = vpow2.f32 %v832_v20 }
 0x976   :  { %v987_v19 = vpop.eup %986 }
 0x977   :  { %390 = vrot.lane.b32.xlu1 %v987_v19, %s1145_s25 }
 0x978   :  { %v989_v21 = vpop.eup %988 }
 0x979   :  { %v384_v22 = vadd.f32 1.0, %v989_v21 }
 0x97b   :  { %990 = vrcp.f32 %v384_v22 }
 0x985   :  { %v991_v23 = vpop.eup %990 }
 0x986   :  { %v388_v26 = vmul.f32 %v991_v23, %v323_v6 }
 0x9e9   :  { %v391_v24 = vpop.permute.xlu1 %390 }
 0x9ea   :  { %v393_v25 = vmul.f32 %v991_v23, %v391_v24 }
 0x9ec   :  { %395 = vrot.lane.b32.xlu0 %v393_v25, %s1154_s3 }
 0xa5e   :  { %v396_v27 = vpop.permute.xlu0 %395 }
 0xa5f   :  { %v398_v28 = vadd.f32 %v396_v27, %v388_v26 }
 0xa61   :  { %992 = vtanh.f32 %v398_v28 }
 0xa6b   :  { %v993_v29 = vpop.eup %992 }
 0xa6c   :  { %401 = vrot.lane.b32.xlu1 %v993_v29, %s1145_s25 }
 0xade   :  { %v402_v30 = vpop.permute.xlu1 %401 }
 0xadf   :  { %v404_v31 = vmul.f32 %v991_v23, %v402_v30 }
 0xae1   :  { %v408_v32 = vpack.c.bf16 %v404_v31, %v404_v31 }
 0xae3   :  { %410 = vrot.lane.b32.xlu0 %v408_v32, %s1154_s3 }
 0xb55   :  { %v411_v33 = vpop.permute.xlu0 %410 }
 0xb56   :  { %909 = vmatmul.mubr.msk.bf16.vlgmr.msra.gmra.mrb[8].mxu0 %vm100_vm2, %v411_v33 }
 0xb57   :  { %921 = vmatpush3.bf16.msra.mxu0 %v1247_v1  ;;  %924 = vmatprep.mubr.msk.bf16.mxu0 %vm1153_vm1, %v1152_v0 }
 0xb58   :  { %922 = vmatprep.subr.bf16.mxu0 %v1152_v0 }
 0xb5b   :  { %923 = vmatpush3.bf16.msra.mxu0 %v1250_v2 }
 0xb5c   :  { %936 = vmatprep.subr.bf16.mxu0 %v1152_v0 }
 0xc29   :  { %v449_v36 = vpop.f32.mrb[8].mxu0 }
 0xc2a   :  { %v455_v37 = vadd.f32 %v449_v36, %v407_v35  ;;  %v910_v38 = vpop.f32.mrb[9].mxu0 }
 0xc2b   :  { %v452_v39 = vpop.f32.mrb[10].mxu0 }
 0xc2c   :  { %994 = vtanh.f32 %v455_v37  ;;  %v911_v40 = vpop.f32.mrb[11].mxu0  ;;  %v834_v42 = vmul.f32 -1.442695, %v455_v37  ;;  %v631_v37 = vld [vmem:[#allocation4 + $0x7] sm:$0x1] }
 0xc2d   :  { %v632_v38 = vunpack.c.l.bf16 %v631_v37 }
 0xc2e   :  { %996 = vpow2.f32 %v834_v42 }
 0xc36   :  { %v995_v41 = vpop.eup %994 }
 0xc37   :  { %465 = vrot.lane.b32.xlu1 %v995_v41, %s1145_s25 }
 0xc38   :  { %v997_v43 = vpop.eup %996 }
 0xc39   :  { %v459_v44 = vadd.f32 1.0, %v997_v43 }
 0xc3b   :  { %998 = vrcp.f32 %v459_v44 }
 0xc45   :  { %v999_v45 = vpop.eup %998 }
 0xc46   :  { %v463_v48 = vmul.f32 %v999_v45, %v398_v28 }
 0xca9   :  { %v466_v46 = vpop.permute.xlu1 %465 }
 0xcaa   :  { %v468_v47 = vmul.f32 %v999_v45, %v466_v46 }
 0xcac   :  { %470 = vrot.lane.b32.xlu0 %v468_v47, %s1154_s3 }
 0xd1e   :  { %v471_v49 = vpop.permute.xlu0 %470 }
 0xd1f   :  { %v473_v50 = vadd.f32 %v471_v49, %v463_v48 }
 0xd21   :  { %1000 = vtanh.f32 %v473_v50 }
 0xd2b   :  { %v1001_v51 = vpop.eup %1000 }
 0xd2c   :  { %476 = vrot.lane.b32.xlu1 %v1001_v51, %s1145_s25 }
 0xd9e   :  { %v477_v52 = vpop.permute.xlu1 %476 }
 0xd9f   :  { %v479_v53 = vmul.f32 %v999_v45, %v477_v52 }
 0xda1   :  { %v483_v54 = vpack.c.bf16 %v479_v53, %v479_v53 }
 0xda3   :  { %485 = vrot.lane.b32.xlu0 %v483_v54, %s1154_s3  ;;  %v960_v54 = vld [vmem:[#allocation9] sm:$0xff]  }
 0xe15   :  { %v486_v55 = vpop.permute.xlu0 %485 }
 0xe16   :  { %917 = vmatmul.mubr.msk.bf16.vlgmr.msra.gmra.mrb[8].mxu1 %vm100_vm2, %v486_v55  ;;  %v961_v55 = vld [vmem:[#allocation9 + $0x8] sm:$0xff]  }
 0xe17   :  { %929 = vmatpush3.bf16.msra.mxu1 %v1247_v1  ;;  %932 = vmatprep.mubr.msk.bf16.mxu1 %vm1153_vm1, %v1152_v0 }
 0xe18   :  { %930 = vmatprep.subr.bf16.mxu1 %v1152_v0 }
 0xe1b   :  { %931 = vmatpush3.bf16.msra.mxu1 %v1250_v2 }
 0xee9   :  { %v524_v58 = vpop.f32.mrb[8].mxu1 }
 0xeea   :  { %v530_v59 = vadd.f32 %v524_v58, %v482_v57  ;;  %v918_v60 = vpop.f32.mrb[9].mxu1  ;;  %v1155_v57 = vmov 1983009808  }
 0xeeb   :  { %v527_v61 = vpop.f32.mrb[10].mxu1  ;;  %v707_v58 = vunpack.c.l.s4 %v1155_v57 }
 0xeec   :  { %1002 = vtanh.f32 %v530_v59  ;;  %v919_v62 = vpop.f32.mrb[11].mxu1  ;;  %v836_v3 = vmul.f32 -1.442695, %v530_v59  ;;  %v709_v59 = vlaneseq }
 0xeed   :  { %v708_v60 = vunpack.c.0.s8 %v707_v58 }
 0xeee   :  { %1004 = vpow2.f32 %v836_v3  ;;  %v710_v61 = vshrl.u32 %v709_v59, 7 }
 0xef6   :  { %v1003_v63 = vpop.eup %1002 }
 0xef7   :  { %540 = vrot.lane.b32.xlu1 %v1003_v63, %s1145_s25  ;;  %v711_v63 = vsub.s32 %v708_v60, %v710_v61 }
 0xef8   :  { %v1005_v1 = vpop.eup %1004 }
 0xef9   :  { %v534_v4 = vadd.f32 1.0, %v1005_v1 }
 0xefb   :  { %1006 = vrcp.f32 %v534_v4 }
 0xf05   :  { %v1007_v5 = vpop.eup %1006 }
 0xf06   :  { %v538_v2 = vmul.f32 %v1007_v5, %v473_v50 }
 0xf69   :  { %v541_v6 = vpop.permute.xlu1 %540 }
 0xf6a   :  { %v543_v7 = vmul.f32 %v1007_v5, %v541_v6 }
 0xf6c   :  { %545 = vrot.lane.b32.xlu0 %v543_v7, %s1154_s3 }
 0xfde   :  { %v546_v8 = vpop.permute.xlu0 %545 }
 0xfdf   :  { %v548_v9 = vadd.f32 %v546_v8, %v538_v2  ;;  %v841_v2 = vld [vmem:[#allocation10] ss:$0 sm:$0xff] }
 0xfe1   :  { %1008 = vtanh.f32 %v548_v9 }
 0xfeb   :  { %v1009_v10 = vpop.eup %1008 }
 0xfec   :  { %551 = vrot.lane.b32.xlu1 %v1009_v10, %s1145_s25 }
0x105e   :  { %v552_v11 = vpop.permute.xlu1 %551 }
0x105f   :  { %v554_v12 = vmul.f32 %v1007_v5, %v552_v11 }
0x1061   :  { %v558_v13 = vpack.c.bf16 %v554_v12, %v554_v12 }
0x1063   :  { %560 = vrot.lane.b32.xlu0 %v558_v13, %s1154_s3 }
0x10d5   :  { %v561_v14 = vpop.permute.xlu0 %560 }
0x10d6   :  { %925 = vmatmul.mubr.msk.bf16.vlgmr.msra.gmra.mrb[12].mxu0 %vm100_vm2, %v561_v14 }
0x10d7   :  { %940 = vmatprep.mubr.msk.bf16.mxu0 %vm1153_vm1, %v1152_v0  ;;  %937 = vmatpush3.bf16.msra.mxu0 %v960_v54 }
0x10d8   :  { %938 = vmatprep.subr.bf16.mxu0 %v1152_v0 }
0x10db   :  { %939 = vmatpush3.bf16.msra.mxu0 %v961_v55 }
0x11a9   :  { %v599_v17 = vpop.f32.mrb[12].mxu0 }
0x11aa   :  { %v605_v18 = vadd.f32 %v599_v17, %v557_v16  ;;  %v926_v19 = vpop.f32.mrb[13].mxu0 }
0x11ab   :  { %v602_v20 = vpop.f32.mrb[14].mxu0 }
0x11ac   :  { %1010 = vtanh.f32 %v605_v18  ;;  %v927_v21 = vpop.f32.mrb[15].mxu0  ;;  %v838_v23 = vmul.f32 -1.442695, %v605_v18 }
0x11ae   :  { %1012 = vpow2.f32 %v838_v23 }
0x11b6   :  { %v1011_v22 = vpop.eup %1010 }
0x11b7   :  { %615 = vrot.lane.b32.xlu1 %v1011_v22, %s1145_s25 }
0x11b8   :  { %v1013_v24 = vpop.eup %1012 }
0x11b9   :  { %v609_v25 = vadd.f32 1.0, %v1013_v24 }
0x11bb   :  { %1014 = vrcp.f32 %v609_v25 }
0x11c5   :  { %v1015_v26 = vpop.eup %1014 }
0x11c6   :  { %v613_v29 = vmul.f32 %v1015_v26, %v548_v9 }
0x1229   :  { %v616_v27 = vpop.permute.xlu1 %615 }
0x122a   :  { %v618_v28 = vmul.f32 %v1015_v26, %v616_v27 }
0x122c   :  { %620 = vrot.lane.b32.xlu0 %v618_v28, %s1154_s3 }
0x129e   :  { %v621_v30 = vpop.permute.xlu0 %620 }
0x129f   :  { %v623_v31 = vadd.f32 %v621_v30, %v613_v29 }
0x12a1   :  { %1016 = vtanh.f32 %v623_v31 }
0x12ab   :  { %v1017_v32 = vpop.eup %1016 }
0x12ac   :  { %626 = vrot.lane.b32.xlu1 %v1017_v32, %s1145_s25 }
0x131e   :  { %v627_v33 = vpop.permute.xlu1 %626 }
0x131f   :  { %v629_v34 = vmul.f32 %v1015_v26, %v627_v33 }
0x1321   :  { %v633_v35 = vpack.c.bf16 %v629_v34, %v629_v34 }
0x1323   :  { %635 = vrot.lane.b32.xlu0 %v633_v35, %s1154_s3 }
0x1395   :  { %v636_v36 = vpop.permute.xlu0 %635 }
0x1396   :  { %933 = vmatmul.mubr.msk.bf16.vlgmr.msra.gmra.mrb[12].mxu1 %vm100_vm2, %v636_v36 }
0x1469   :  { %v674_v39 = vpop.f32.mrb[12].mxu1 }
0x146a   :  { %v680_v40 = vadd.f32 %v674_v39, %v632_v38  ;;  %v934_v41 = vpop.f32.mrb[13].mxu1 }
0x146b   :  { %v677_v42 = vpop.f32.mrb[14].mxu1 }
0x146c   :  { %1018 = vtanh.f32 %v680_v40  ;;  %v935_v43 = vpop.f32.mrb[15].mxu1  ;;  %v840_v45 = vmul.f32 -1.442695, %v680_v40 }
0x146e   :  { %1020 = vpow2.f32 %v840_v45 }
0x1476   :  { %v1019_v44 = vpop.eup %1018 }
0x1477   :  { %690 = vrot.lane.b32.xlu1 %v1019_v44, %s1145_s25 }
0x1478   :  { %v1021_v46 = vpop.eup %1020 }
0x1479   :  { %v684_v47 = vadd.f32 1.0, %v1021_v46 }
0x147b   :  { %1022 = vrcp.f32 %v684_v47 }
0x1485   :  { %v1023_v48 = vpop.eup %1022 }
0x1486   :  { %v688_v51 = vmul.f32 %v1023_v48, %v623_v31 }
0x14e9   :  { %v691_v49 = vpop.permute.xlu1 %690 }
0x14ea   :  { %v693_v50 = vmul.f32 %v1023_v48, %v691_v49 }
0x14ec   :  { %695 = vrot.lane.b32.xlu0 %v693_v50, %s1154_s3 }
0x155e   :  { %v696_v52 = vpop.permute.xlu0 %695 }
0x155f   :  { %v698_v53 = vadd.f32 %v696_v52, %v688_v51 }
0x1561   :  { %1024 = vtanh.f32 %v698_v53  ;;  %v725_v5 = vrot.slane %v698_v53, %v711_v63 }
0x156b   :  { %v1025_v56 = vpop.eup %1024 }
0x156c   :  { %701 = vrot.lane.b32.xlu1 %v1025_v56, %s1145_s25  ;;  %s1157_s25 = smov [#allocation12]  }
0x156d   :  { %s811_s14 = sshll.u32 %s1157_s25, 4  ;;  %s812_s14 = int_to_ptr.vmem [resolvable:$true] %s811_s14 }
0x156e   :  { %s1114_s15 = scalar_lea.vmem %s812_s14, 32  ;;  %p1119_p5 = scmp.lt.s32.totalorder %s812_s14, %s812_s14 }
0x156f   :  { %p1115_p4 = scmp.ne.s32.totalorder %s812_s14, %s1114_s15  ;;  %p1120_p6 = scmp.lt.s32.totalorder %s1114_s15, %s1114_s15 }
0x1571   :  { %p1121_p7 = por %p1120_p6, %p1119_p5 }
0x1573   :  { %p1122_p8 = pnand %p1121_p7, %p1115_p4 }
0x15de   :  { %v702_v62 = vpop.permute.xlu1 %701 }
0x15df   :  { %v704_v3 = vmul.f32 %v1023_v48, %v702_v62 }
0x15e1   :  { %v712_v1 = vrot.slane %v704_v3, %v711_v63  ;;  %v733_v4 = vpack.c.bf16 %v704_v3, %v704_v3 }
0x15e3   :  { %746 = vrot.lane.b32.xlu0 %v733_v4, %s1154_s3  ;;  %713 = vrot.lane.b32.xlu1 %v712_v1, %s1154_s3 }
0x15e7   :  { %726 = vrot.lane.b32.xlu0 %v725_v5, %s1156_s13 }
0x1655   :  { %v747_v0 = vpop.permute.xlu0 %746  ;;  %v714_v6 = vpop.permute.xlu1 %713 }
0x1656   :  { %717 = vst.msk [vmem:[#allocation2] sm:$0x3] %vm76_vm0, %v714_v6  ;;  %941 = vmatmul.mubr.msk.bf16.vlgmr.msra.gmra.mrb[16].mxu0 %vm100_vm2, %v747_v0 }
0x1659   :  { %v727_v7 = vpop.permute.xlu0 %726 }
0x165a   :  { %729 = vst.msk [vmem:[#allocation3] sm:$0x3] %vm76_vm0, %v727_v7 }
0x1729   :  { %v797_v8 = vpop.f32.mrb[16].mxu0 }
0x172a   :  { %v798_v9 = vadd.f32 %v841_v2, %v797_v8  ;;  %v942_v10 = vpop.f32.mrb[17].mxu0 }
0x172b   :  { %v800_v11 = vpop.f32.mrb[18].mxu0 }
0x172c   :  { %v943_v12 = vpop.f32.mrb[19].mxu0  ;;  %804 = vst.msk [vmem:[#allocation12] sm:$0x3] %vm803_vm3, %v798_v9 }
0x172d   :  { %1125 = shalt.err (!%p1122_p8)
}
0x172e   :  { %s1126_s18 = scalar_lea.hbm %s1358_s4, 32 }
0x172f   :  { %p1127_p9 = scmp.ne.s32.totalorder %s1358_s4, %s1126_s18  ;;  %p1130_p10 = scmp.lt.u32.totalorder %s1126_s18, %s1358_s4 }
0x1731   :  { %p1132_p11 = pnand %p1130_p10, %p1127_p9 }
0x1733   :  { %1135 = shalt.err (!%p1132_p11)
}
0x1734   :  { %814 = dma.vmem_to_hbm [thread:$0]  %s812_s14, 32, %s1358_s4, [#allocation6]  }
0x1735   :  { %1142 = dma.done.wait [#allocation6], 32  }
0x1736   :  { %1143 = vsyncadd [#allocation6], 4294967264 }
0x1737   :  { %818 = vsyncpa [#allocation5], 1 }
0x1738   :  { %819 = vsyncpa [#allocation8], 1 }
0x1739   :  { %820 = vsyncpa [#allocation11], 1 }
0x173a   :  { %821 = vsyncpa [#allocation6], 1 }

</bundles_post_ra>
